<compile_context>
chip_gen: v7x
topology: tpu7x:2x2x1
jax: 0.10.0
libtpu: 0.0.40
codegen_flags: <defaults>
</compile_context>

<pallas_src>
import jax
import jax.numpy as jnp
import numpy as np
from jax import lax
from jax.experimental import pallas as pl
from jax.experimental.pallas import tpu as pltpu


def convblock_kernel(xm_ref, xh_ref, w_ref, b_ref, scale_ref, shift_ref, out_ref, xbuf):
    # xm_ref:  (TH, W+2, Cin)    main rows of the padded input window (staging dtype)
    # xh_ref:  (2,  W+2, Cin)    2-row bottom halo (staging dtype)
    # w_ref:   (9, Cin, Cout_p)  fused depthwise*pointwise weights, one (Cin,Cout_p) per tap
    # b/scale/shift: (1, Cout_p) pointwise bias and folded BatchNorm scale/shift
    # out_ref: (THo, Wo, Cout_p) pooled output tile
    # xbuf:    (TH+2, W+2, Cin)  VMEM scratch holding the stitched halo'd window
    TH, Wp, Cin = xm_ref.shape
    W = Wp - 2
    THo, Wo, Cout = out_ref.shape

    # Stitch main + halo into one contiguous window (VMEM-only copy; the HBM loads
    # themselves are pipelined by the BlockSpec machinery, no wrapper unfold).
    xbuf[0:TH, :, :] = xm_ref[...]
    xbuf[TH:TH + 2, :, :] = xh_ref[...]

    # SeparableConv2d fused into 9 accumulating MXU dots (K = Cin per tap, f32 acc).
    acc = jnp.zeros((TH * W, Cout), jnp.float32)
    for t in range(9):
        kh, kw = divmod(t, 3)
        a = xbuf[kh:kh + TH, kw:kw + W, :].astype(jnp.float32).reshape(TH * W, Cin)
        acc = acc + jnp.dot(a, w_ref[t], preferred_element_type=jnp.float32)

    y = acc + b_ref[0, :]                        # pointwise bias
    y = jnp.where(y > 0, y, 0.2 * y)             # LeakyReLU(0.2)
    y = y * scale_ref[0, :] + shift_ref[0, :]    # BatchNorm2d (eval) folded scale/shift

    # MaxPool2d((2, 2)): H-pool over leading-dim row pairs first (cheap), then W-pool.
    y = y.reshape(THo, 2, W, Cout)
    y = jnp.max(y, axis=1)
    y = y.reshape(THo, Wo, 2, Cout)
    y = jnp.max(y, axis=2)

    # Dropout: identity in eval mode.
    out_ref[...] = y.astype(out_ref.dtype)


def _vmem_capacity_bytes():
    try:
        return int(pltpu.get_tpu_info().vmem_capacity_bytes)
    except Exception:
        return 64 * 2**20   # conservative fallback: v7x per-TensorCore VMEM


def _tile_bytes(tho, W, Cin, Cout_p, itemsize):
    th = 2 * tho
    return (2 * th * (W + 2) * Cin * itemsize        # double-buffered main input block
            + 2 * 2 * (W + 2) * Cin * itemsize       # double-buffered halo block
            + (th + 2) * (W + 2) * Cin * itemsize    # stitched-window VMEM scratch
            + 2 * th * W * Cout_p * 4                # f32 accumulator + per-tap partial
            + 2 * tho * (W // 2) * Cout_p * 4        # double-buffered output tile
            + (9 * Cin + 3) * Cout_p * 4)            # weights / bias / scale / shift


def _choose_tile(Ho, W, Cin, Cout_p, itemsize, target_rows, vmem_budget):
    """Pooled-H rows per tile: a divisor of Ho, as large as the VMEM budget allows,
    stopping once the MXU M dim (TH*W) reaches target_rows."""
    divisors = [d for d in range(1, Ho + 1) if Ho % d == 0]
    pick = None
    for d in divisors:
        if _tile_bytes(d, W, Cin, Cout_p, itemsize) > vmem_budget:
            break
        pick = d
        if 2 * d * W >= target_rows:
            break
    if pick is None:
        # TODO(synk): add a W-tiling fallback for extremely wide rows / huge Cin.
        raise ValueError("ConvBlock tile does not fit in the VMEM budget")
    return pick


def conv_block(x_nchw, dw_weight, pw_weight, pw_bias,
               bn_gamma, bn_beta, bn_mean, bn_var, bn_eps=1e-3,
               *, storage_dtype=jnp.bfloat16, target_rows=1024):
    N, Cin, H, W = x_nchw.shape
    Cout = pw_weight.shape[0]
    assert H % 2 == 0 and W % 2 == 0, "MaxPool2d((2,2)) requires even H and W"
    Ho, Wo = H // 2, W // 2

    Cout_p = ((Cout + 127) // 128) * 128        # lane-dense stores + MXU-friendly N
    itemsize = jnp.dtype(storage_dtype).itemsize

    vmem_cap = _vmem_capacity_bytes()
    THo = _choose_tile(Ho, W, Cin, Cout_p, itemsize, target_rows,
                       vmem_budget=max(12 * 2**20, (2 * vmem_cap) // 5))
    TH = 2 * THo
    n_tiles = Ho // THo

    # --- single fused pre-pass: NCHW->NHWC transpose + cast to staging dtype + pad ---
    x = jnp.transpose(x_nchw, (0, 2, 3, 1)).astype(storage_dtype)        # (N,H,W,Cin)
    xpad = jnp.pad(x, ((0, 0), (1, 1), (1, 1), (0, 0)))                  # (N,H+2,W+2,Cin)

    # --- fold depthwise*pointwise and BatchNorm into small dense (padded) params ----
    dww = jnp.transpose(dw_weight[:, 0], (1, 2, 0)).astype(jnp.float32)      # (3,3,Cin)
    pww = pw_weight[:, :, 0, 0].T.astype(jnp.float32)                        # (Cin,Cout)
    wc = dww.reshape(9, Cin, 1) * pww.reshape(1, Cin, Cout)                  # (9,Cin,Cout)
    wc = jnp.pad(wc, ((0, 0), (0, 0), (0, Cout_p - Cout)))
    pwb = jnp.pad(pw_bias.astype(jnp.float32), (0, Cout_p - Cout)).reshape(1, Cout_p)
    inv_std = (bn_gamma / jnp.sqrt(bn_var + bn_eps)).astype(jnp.float32)
    scale = jnp.pad(inv_std, (0, Cout_p - Cout)).reshape(1, Cout_p)
    shift = jnp.pad((bn_beta - bn_mean * inv_std).astype(jnp.float32),
                    (0, Cout_p - Cout)).reshape(1, Cout_p)

    est = _tile_bytes(THo, W, Cin, Cout_p, itemsize)
    vmem_limit = int(min((7 * vmem_cap) // 8, max(32 * 2**20, 2 * est)))

    out_nhwc = pl.pallas_call(
        convblock_kernel,
        out_shape=jax.ShapeDtypeStruct((N, Ho, Wo, Cout_p), jnp.float32),
        grid=(N, n_tiles),
        in_specs=[
            # main TH-row block of the padded input (non-overlapping)
            pl.BlockSpec((None, TH, W + 2, Cin), lambda n, i: (n, i, 0, 0)),
            # 2-row bottom halo: same array, rows [(i+1)*TH, (i+1)*TH + 2)
            pl.BlockSpec((None, 2, W + 2, Cin), lambda n, i: (n, (i + 1) * THo, 0, 0)),
            pl.BlockSpec((9, Cin, Cout_p), lambda n, i: (0, 0, 0)),
            pl.BlockSpec((1, Cout_p), lambda n, i: (0, 0)),
            pl.BlockSpec((1, Cout_p), lambda n, i: (0, 0)),
            pl.BlockSpec((1, Cout_p), lambda n, i: (0, 0)),
        ],
        out_specs=pl.BlockSpec((None, THo, Wo, Cout_p), lambda n, i: (n, i, 0, 0)),
        scratch_shapes=[pltpu.VMEM((TH + 2, W + 2, Cin), storage_dtype)],
        compiler_params=pltpu.CompilerParams(
            dimension_semantics=("parallel", "parallel"),
            vmem_limit_bytes=vmem_limit,
        ),
    )(xpad, xpad, wc, pwb, scale, shift)

    # Fused post-pass: drop channel padding and return NCHW to match PyTorch.
    return jnp.transpose(out_nhwc[..., :Cout], (0, 3, 1, 2))


def conv_block_ref(x, dw_weight, pw_weight, pw_bias, gamma, beta, mean, var,
                   eps=1e-3):
    """Plain-JAX reference (same inference-mode semantics)."""
    Cin = x.shape[1]
    y = lax.conv_general_dilated(x, dw_weight, (1, 1), ((1, 1), (1, 1)),
                                 feature_group_count=Cin,
                                 dimension_numbers=('NCHW', 'OIHW', 'NCHW'))
    y = lax.conv_general_dilated(y, pw_weight, (1, 1), ((0, 0), (0, 0)),
                                 dimension_numbers=('NCHW', 'OIHW', 'NCHW'))
    y = y + pw_bias[None, :, None, None]
    y = jnp.where(y > 0, y, 0.2 * y)
    y = (y - mean[None, :, None, None]) / jnp.sqrt(var[None, :, None, None] + eps)
    y = y * gamma[None, :, None, None] + beta[None, :, None, None]
    N, C, H, W = y.shape
    return y.reshape(N, C, H // 2, 2, W // 2, 2).max(axis=(3, 5))


if __name__ == "__main__":
    N, Cin, Cout, H, W = 2, 4, 8, 16, 16
    key = jax.random.PRNGKey(0)
    k = jax.random.split(key, 8)

    x = jax.random.normal(k[0], (N, Cin, H, W), jnp.float32)
    dw_weight = jax.random.normal(k[1], (Cin, 1, 3, 3), jnp.float32) * 0.5
    pw_weight = jax.random.normal(k[2], (Cout, Cin, 1, 1), jnp.float32) * 0.5
    pw_bias = jax.random.normal(k[3], (Cout,), jnp.float32) * 0.1
    bn_gamma = 1.0 + 0.1 * jax.random.normal(k[4], (Cout,), jnp.float32)
    bn_beta = 0.1 * jax.random.normal(k[5], (Cout,), jnp.float32)
    bn_mean = 0.1 * jax.random.normal(k[6], (Cout,), jnp.float32)
    bn_var = jax.random.uniform(k[7], (Cout,), jnp.float32, minval=0.5, maxval=1.5)

    ref = conv_block_ref(x, dw_weight, pw_weight, pw_bias,
                         bn_gamma, bn_beta, bn_mean, bn_var)

    # 1) f32 staging with forced multi-tile halo path (tight tolerance)
    out_f32 = conv_block(x, dw_weight, pw_weight, pw_bias,
                         bn_gamma, bn_beta, bn_mean, bn_var,
                         storage_dtype=jnp.float32, target_rows=64)
    out_f32 = jax.block_until_ready(out_f32)
    assert out_f32.shape == (N, Cout, H // 2, W // 2), out_f32.shape
    np.testing.assert_allclose(np.asarray(out_f32), np.asarray(ref),
                               atol=1e-4, rtol=1e-4)

    # 2) default: bf16 staging, tile sized by the generation-aware VMEM budget
    out_bf16 = conv_block(x, dw_weight, pw_weight, pw_bias,
                          bn_gamma, bn_beta, bn_mean, bn_var)
    out_bf16 = jax.block_until_ready(out_bf16)
    np.testing.assert_allclose(np.asarray(out_bf16), np.asarray(ref),
                               atol=5e-2, rtol=5e-2)

    # 3) bf16 staging with forced multi-tile halo path
    out_bf16_t = conv_block(x, dw_weight, pw_weight, pw_bias,
                            bn_gamma, bn_beta, bn_mean, bn_var, target_rows=64)
    out_bf16_t = jax.block_until_ready(out_bf16_t)
    np.testing.assert_allclose(np.asarray(out_bf16_t), np.asarray(ref),
                               atol=5e-2, rtol=5e-2)

    print("KERNEL_OK")
</pallas_src>

<mosaic_0001>
module attributes {stable_mosaic.version = 11 : i64} {
  func.func @convblock_kernel(%arg0: i32, %arg1: i32, %arg2: memref<1x4x18x4xf32, #tpu.memory_space<vmem>>, %arg3: memref<1x2x18x4xf32, #tpu.memory_space<vmem>>, %arg4: memref<9x4x128xf32, #tpu.memory_space<vmem>>, %arg5: memref<1x128xf32, #tpu.memory_space<vmem>>, %arg6: memref<1x128xf32, #tpu.memory_space<vmem>>, %arg7: memref<1x128xf32, #tpu.memory_space<vmem>>, %arg8: memref<1x2x8x128xf32, #tpu.memory_space<vmem>>, %arg9: memref<6x18x4xf32, #tpu.memory_space<vmem>>) attributes {dimension_semantics = [#tpu.dimension_semantics<parallel>, #tpu.dimension_semantics<parallel>], iteration_bounds = array<i64: 2, 4>, scalar_prefetch = 0 : i64, scratch_operands = 1 : i64, tpu.core_type = #tpu.core_type<tc>, window_params = [{transform_indices = @transform_0, window_bounds = array<i64: 1, 4, 18, 4>}, {transform_indices = @transform_1, window_bounds = array<i64: 1, 2, 18, 4>}, {pipeline_mode = #tpu.pipeline_mode<synchronous>, transform_indices = @transform_2, window_bounds = array<i64: 9, 4, 128>}, {pipeline_mode = #tpu.pipeline_mode<synchronous>, transform_indices = @transform_3, window_bounds = array<i64: 1, 128>}, {pipeline_mode = #tpu.pipeline_mode<synchronous>, transform_indices = @transform_4, window_bounds = array<i64: 1, 128>}, {pipeline_mode = #tpu.pipeline_mode<synchronous>, transform_indices = @transform_5, window_bounds = array<i64: 1, 128>}, {transform_indices = @transform_6, window_bounds = array<i64: 1, 2, 8, 128>}]} {
    %c0 = arith.constant 0 : index
    %c0_0 = arith.constant 0 : index
    %c0_1 = arith.constant 0 : index
    %c0_2 = arith.constant 0 : index
    %0 = vector.load %arg2[%c0, %c0_0, %c0_1, %c0_2] : memref<1x4x18x4xf32, #tpu.memory_space<vmem>>, vector<1x4x18x4xf32>
    %1 = vector.shape_cast %0 : vector<1x4x18x4xf32> to vector<4x18x4xf32>
    %c0_3 = arith.constant 0 : index
    %c0_4 = arith.constant 0 : index
    %c0_5 = arith.constant 0 : index
    %2 = vector.load %arg9[%c0_3, %c0_4, %c0_5] : memref<6x18x4xf32, #tpu.memory_space<vmem>>, vector<4x18x4xf32>
    tpu.vector_store %arg9[%c0_3, %c0_4, %c0_5], %1 {strides = array<i32>} : memref<6x18x4xf32, #tpu.memory_space<vmem>>, vector<4x18x4xf32>,
    %c0_6 = arith.constant 0 : index
    %c0_7 = arith.constant 0 : index
    %c0_8 = arith.constant 0 : index
    %c0_9 = arith.constant 0 : index
    %3 = vector.load %arg3[%c0_6, %c0_7, %c0_8, %c0_9] : memref<1x2x18x4xf32, #tpu.memory_space<vmem>>, vector<1x2x18x4xf32>
    %4 = vector.shape_cast %3 : vector<1x2x18x4xf32> to vector<2x18x4xf32>
    %c4 = arith.constant 4 : index
    %c0_10 = arith.constant 0 : index
    %c0_11 = arith.constant 0 : index
    %5 = vector.load %arg9[%c4, %c0_10, %c0_11] : memref<6x18x4xf32, #tpu.memory_space<vmem>>, vector<2x18x4xf32>
    tpu.vector_store %arg9[%c4, %c0_10, %c0_11], %4 {strides = array<i32>} : memref<6x18x4xf32, #tpu.memory_space<vmem>>, vector<2x18x4xf32>,
    %cst = arith.constant 0.000000e+00 : f32
    %6 = vector.broadcast %cst : f32 to vector<64x128xf32>
    %c0_12 = arith.constant 0 : index
    %c0_13 = arith.constant 0 : index
    %c0_14 = arith.constant 0 : index
    %7 = vector.load %arg9[%c0_12, %c0_13, %c0_14] : memref<6x18x4xf32, #tpu.memory_space<vmem>>, vector<4x16x4xf32>
    %8 = vector.shape_cast %7 : vector<4x16x4xf32> to vector<64x4xf32>
    %c0_15 = arith.constant 0 : index
    %c0_16 = arith.constant 0 : index
    %c0_17 = arith.constant 0 : index
    %9 = vector.load %arg4[%c0_15, %c0_16, %c0_17] : memref<9x4x128xf32, #tpu.memory_space<vmem>>, vector<1x4x128xf32>
    %10 = vector.shape_cast %9 : vector<1x4x128xf32> to vector<4x128xf32>
    %cst_18 = arith.constant dense<0.000000e+00> : vector<64x128xf32>
    %11 = tpu.matmul %8, %10, %cst_18 {dimension_numbers = #tpu.dot_dimension_numbers<[1], [0], [0], [1], [0, 0, 1, 1], [], []>} : vector<64x4xf32>, vector<4x128xf32>, vector<64x128xf32> -> vector<64x128xf32>
    %12 = arith.addf %6, %11 : vector<64x128xf32>
    %c0_19 = arith.constant 0 : index
    %c1 = arith.constant 1 : index
    %c0_20 = arith.constant 0 : index
    %13 = vector.load %arg9[%c0_19, %c1, %c0_20] : memref<6x18x4xf32, #tpu.memory_space<vmem>>, vector<4x16x4xf32>
    %14 = vector.shape_cast %13 : vector<4x16x4xf32> to vector<64x4xf32>
    %c1_21 = arith.constant 1 : index
    %c0_22 = arith.constant 0 : index
    %c0_23 = arith.constant 0 : index
    %15 = vector.load %arg4[%c1_21, %c0_22, %c0_23] : memref<9x4x128xf32, #tpu.memory_space<vmem>>, vector<1x4x128xf32>
    %16 = vector.shape_cast %15 : vector<1x4x128xf32> to vector<4x128xf32>
    %cst_24 = arith.constant dense<0.000000e+00> : vector<64x128xf32>
    %17 = tpu.matmul %14, %16, %cst_24 {dimension_numbers = #tpu.dot_dimension_numbers<[1], [0], [0], [1], [0, 0, 1, 1], [], []>} : vector<64x4xf32>, vector<4x128xf32>, vector<64x128xf32> -> vector<64x128xf32>
    %18 = arith.addf %12, %17 : vector<64x128xf32>
    %c0_25 = arith.constant 0 : index
    %c2 = arith.constant 2 : index
    %c0_26 = arith.constant 0 : index
    %19 = vector.load %arg9[%c0_25, %c2, %c0_26] : memref<6x18x4xf32, #tpu.memory_space<vmem>>, vector<4x16x4xf32>
    %20 = vector.shape_cast %19 : vector<4x16x4xf32> to vector<64x4xf32>
    %c2_27 = arith.constant 2 : index
    %c0_28 = arith.constant 0 : index
    %c0_29 = arith.constant 0 : index
    %21 = vector.load %arg4[%c2_27, %c0_28, %c0_29] : memref<9x4x128xf32, #tpu.memory_space<vmem>>, vector<1x4x128xf32>
    %22 = vector.shape_cast %21 : vector<1x4x128xf32> to vector<4x128xf32>
    %cst_30 = arith.constant dense<0.000000e+00> : vector<64x128xf32>
    %23 = tpu.matmul %20, %22, %cst_30 {dimension_numbers = #tpu.dot_dimension_numbers<[1], [0], [0], [1], [0, 0, 1, 1], [], []>} : vector<64x4xf32>, vector<4x128xf32>, vector<64x128xf32> -> vector<64x128xf32>
    %24 = arith.addf %18, %23 : vector<64x128xf32>
    %c1_31 = arith.constant 1 : index
    %c0_32 = arith.constant 0 : index
    %c0_33 = arith.constant 0 : index
    %25 = vector.load %arg9[%c1_31, %c0_32, %c0_33] : memref<6x18x4xf32, #tpu.memory_space<vmem>>, vector<4x16x4xf32>
    %26 = vector.shape_cast %25 : vector<4x16x4xf32> to vector<64x4xf32>
    %c3 = arith.constant 3 : index
    %c0_34 = arith.constant 0 : index
    %c0_35 = arith.constant 0 : index
    %27 = vector.load %arg4[%c3, %c0_34, %c0_35] : memref<9x4x128xf32, #tpu.memory_space<vmem>>, vector<1x4x128xf32>
    %28 = vector.shape_cast %27 : vector<1x4x128xf32> to vector<4x128xf32>
    %cst_36 = arith.constant dense<0.000000e+00> : vector<64x128xf32>
    %29 = tpu.matmul %26, %28, %cst_36 {dimension_numbers = #tpu.dot_dimension_numbers<[1], [0], [0], [1], [0, 0, 1, 1], [], []>} : vector<64x4xf32>, vector<4x128xf32>, vector<64x128xf32> -> vector<64x128xf32>
    %30 = arith.addf %24, %29 : vector<64x128xf32>
    %c1_37 = arith.constant 1 : index
    %c1_38 = arith.constant 1 : index
    %c0_39 = arith.constant 0 : index
    %31 = vector.load %arg9[%c1_37, %c1_38, %c0_39] : memref<6x18x4xf32, #tpu.memory_space<vmem>>, vector<4x16x4xf32>
    %32 = vector.shape_cast %31 : vector<4x16x4xf32> to vector<64x4xf32>
    %c4_40 = arith.constant 4 : index
    %c0_41 = arith.constant 0 : index
    %c0_42 = arith.constant 0 : index
    %33 = vector.load %arg4[%c4_40, %c0_41, %c0_42] : memref<9x4x128xf32, #tpu.memory_space<vmem>>, vector<1x4x128xf32>
    %34 = vector.shape_cast %33 : vector<1x4x128xf32> to vector<4x128xf32>
    %cst_43 = arith.constant dense<0.000000e+00> : vector<64x128xf32>
    %35 = tpu.matmul %32, %34, %cst_43 {dimension_numbers = #tpu.dot_dimension_numbers<[1], [0], [0], [1], [0, 0, 1, 1], [], []>} : vector<64x4xf32>, vector<4x128xf32>, vector<64x128xf32> -> vector<64x128xf32>
    %36 = arith.addf %30, %35 : vector<64x128xf32>
    %c1_44 = arith.constant 1 : index
    %c2_45 = arith.constant 2 : index
    %c0_46 = arith.constant 0 : index
    %37 = vector.load %arg9[%c1_44, %c2_45, %c0_46] : memref<6x18x4xf32, #tpu.memory_space<vmem>>, vector<4x16x4xf32>
    %38 = vector.shape_cast %37 : vector<4x16x4xf32> to vector<64x4xf32>
    %c5 = arith.constant 5 : index
    %c0_47 = arith.constant 0 : index
    %c0_48 = arith.constant 0 : index
    %39 = vector.load %arg4[%c5, %c0_47, %c0_48] : memref<9x4x128xf32, #tpu.memory_space<vmem>>, vector<1x4x128xf32>
    %40 = vector.shape_cast %39 : vector<1x4x128xf32> to vector<4x128xf32>
    %cst_49 = arith.constant dense<0.000000e+00> : vector<64x128xf32>
    %41 = tpu.matmul %38, %40, %cst_49 {dimension_numbers = #tpu.dot_dimension_numbers<[1], [0], [0], [1], [0, 0, 1, 1], [], []>} : vector<64x4xf32>, vector<4x128xf32>, vector<64x128xf32> -> vector<64x128xf32>
    %42 = arith.addf %36, %41 : vector<64x128xf32>
    %c2_50 = arith.constant 2 : index
    %c0_51 = arith.constant 0 : index
    %c0_52 = arith.constant 0 : index
    %43 = vector.load %arg9[%c2_50, %c0_51, %c0_52] : memref<6x18x4xf32, #tpu.memory_space<vmem>>, vector<4x16x4xf32>
    %44 = vector.shape_cast %43 : vector<4x16x4xf32> to vector<64x4xf32>
    %c6 = arith.constant 6 : index
    %c0_53 = arith.constant 0 : index
    %c0_54 = arith.constant 0 : index
    %45 = vector.load %arg4[%c6, %c0_53, %c0_54] : memref<9x4x128xf32, #tpu.memory_space<vmem>>, vector<1x4x128xf32>
    %46 = vector.shape_cast %45 : vector<1x4x128xf32> to vector<4x128xf32>
    %cst_55 = arith.constant dense<0.000000e+00> : vector<64x128xf32>
    %47 = tpu.matmul %44, %46, %cst_55 {dimension_numbers = #tpu.dot_dimension_numbers<[1], [0], [0], [1], [0, 0, 1, 1], [], []>} : vector<64x4xf32>, vector<4x128xf32>, vector<64x128xf32> -> vector<64x128xf32>
    %48 = arith.addf %42, %47 : vector<64x128xf32>
    %c2_56 = arith.constant 2 : index
    %c1_57 = arith.constant 1 : index
    %c0_58 = arith.constant 0 : index
    %49 = vector.load %arg9[%c2_56, %c1_57, %c0_58] : memref<6x18x4xf32, #tpu.memory_space<vmem>>, vector<4x16x4xf32>
    %50 = vector.shape_cast %49 : vector<4x16x4xf32> to vector<64x4xf32>
    %c7 = arith.constant 7 : index
    %c0_59 = arith.constant 0 : index
    %c0_60 = arith.constant 0 : index
    %51 = vector.load %arg4[%c7, %c0_59, %c0_60] : memref<9x4x128xf32, #tpu.memory_space<vmem>>, vector<1x4x128xf32>
    %52 = vector.shape_cast %51 : vector<1x4x128xf32> to vector<4x128xf32>
    %cst_61 = arith.constant dense<0.000000e+00> : vector<64x128xf32>
    %53 = tpu.matmul %50, %52, %cst_61 {dimension_numbers = #tpu.dot_dimension_numbers<[1], [0], [0], [1], [0, 0, 1, 1], [], []>} : vector<64x4xf32>, vector<4x128xf32>, vector<64x128xf32> -> vector<64x128xf32>
    %54 = arith.addf %48, %53 : vector<64x128xf32>
    %c2_62 = arith.constant 2 : index
    %c2_63 = arith.constant 2 : index
    %c0_64 = arith.constant 0 : index
    %55 = vector.load %arg9[%c2_62, %c2_63, %c0_64] : memref<6x18x4xf32, #tpu.memory_space<vmem>>, vector<4x16x4xf32>
    %56 = vector.shape_cast %55 : vector<4x16x4xf32> to vector<64x4xf32>
    %c8 = arith.constant 8 : index
    %c0_65 = arith.constant 0 : index
    %c0_66 = arith.constant 0 : index
    %57 = vector.load %arg4[%c8, %c0_65, %c0_66] : memref<9x4x128xf32, #tpu.memory_space<vmem>>, vector<1x4x128xf32>
    %58 = vector.shape_cast %57 : vector<1x4x128xf32> to vector<4x128xf32>
    %cst_67 = arith.constant dense<0.000000e+00> : vector<64x128xf32>
    %59 = tpu.matmul %56, %58, %cst_67 {dimension_numbers = #tpu.dot_dimension_numbers<[1], [0], [0], [1], [0, 0, 1, 1], [], []>} : vector<64x4xf32>, vector<4x128xf32>, vector<64x128xf32> -> vector<64x128xf32>
    %60 = arith.addf %54, %59 : vector<64x128xf32>
    %c0_68 = arith.constant 0 : index
    %c0_69 = arith.constant 0 : index
    %61 = vector.load %arg5[%c0_68, %c0_69] : memref<1x128xf32, #tpu.memory_space<vmem>>, vector<1x128xf32>
    %62 = vector.shape_cast %61 : vector<1x128xf32> to vector<128xf32>
    %63 = vector.shape_cast %62 : vector<128xf32> to vector<1x128xf32>
    %64 = vector.broadcast %63 : vector<1x128xf32> to vector<64x128xf32>
    %65 = arith.addf %60, %64 : vector<64x128xf32>
    %cst_70 = arith.constant 0.000000e+00 : f32
    %66 = vector.broadcast %cst_70 : f32 to vector<64x128xf32>
    %67 = arith.cmpf ogt, %65, %66 : vector<64x128xf32>
    %cst_71 = arith.constant 2.000000e-01 : f32
    %68 = vector.broadcast %cst_71 : f32 to vector<64x128xf32>
    %69 = arith.mulf %68, %65 : vector<64x128xf32>
    %70 = arith.select %67, %65, %69 : vector<64x128xi1>, vector<64x128xf32>
    %c0_72 = arith.constant 0 : index
    %c0_73 = arith.constant 0 : index
    %71 = vector.load %arg6[%c0_72, %c0_73] : memref<1x128xf32, #tpu.memory_space<vmem>>, vector<1x128xf32>
    %72 = vector.shape_cast %71 : vector<1x128xf32> to vector<128xf32>
    %73 = vector.shape_cast %72 : vector<128xf32> to vector<1x128xf32>
    %74 = vector.broadcast %73 : vector<1x128xf32> to vector<64x128xf32>
    %75 = arith.mulf %70, %74 : vector<64x128xf32>
    %c0_74 = arith.constant 0 : index
    %c0_75 = arith.constant 0 : index
    %76 = vector.load %arg7[%c0_74, %c0_75] : memref<1x128xf32, #tpu.memory_space<vmem>>, vector<1x128xf32>
    %77 = vector.shape_cast %76 : vector<1x128xf32> to vector<128xf32>
    %78 = vector.shape_cast %77 : vector<128xf32> to vector<1x128xf32>
    %79 = vector.broadcast %78 : vector<1x128xf32> to vector<64x128xf32>
    %80 = arith.addf %75, %79 : vector<64x128xf32>
    %81 = vector.shape_cast %80 : vector<64x128xf32> to vector<2x2x16x128xf32>
    %cst_76 = arith.constant dense<0xFF800000> : vector<2x16x128xf32>
    %82 = vector.multi_reduction <maximumf>, %81, %cst_76 [1] : vector<2x2x16x128xf32> to vector<2x16x128xf32>
    %83 = vector.shape_cast %82 : vector<2x16x128xf32> to vector<2x8x2x128xf32>
    %cst_77 = arith.constant dense<0xFF800000> : vector<2x8x128xf32>
    %84 = vector.multi_reduction <maximumf>, %83, %cst_77 [2] : vector<2x8x2x128xf32> to vector<2x8x128xf32>
    %c0_78 = arith.constant 0 : index
    %c0_79 = arith.constant 0 : index
    %c0_80 = arith.constant 0 : index
    %c0_81 = arith.constant 0 : index
    %85 = vector.load %arg8[%c0_78, %c0_79, %c0_80, %c0_81] : memref<1x2x8x128xf32, #tpu.memory_space<vmem>>, vector<1x2x8x128xf32>
    %86 = vector.shape_cast %85 : vector<1x2x8x128xf32> to vector<2x8x128xf32>
    %87 = vector.shape_cast %84 : vector<2x8x128xf32> to vector<1x2x8x128xf32>
    tpu.vector_store %arg8[%c0_78, %c0_79, %c0_80, %c0_81], %87 {strides = array<i32>} : memref<1x2x8x128xf32, #tpu.memory_space<vmem>>, vector<1x2x8x128xf32>,
    return
  }
  func.func @transform_0(%arg0: i32, %arg1: i32) -> (i32, i32, i32, i32) {
    %c0_i32 = arith.constant 0 : i32
    %c0_i32_0 = arith.constant 0 : i32
    %c0_i32_1 = arith.constant 0 : i32
    return %arg0, %arg1, %c0_i32, %c0_i32_0 : i32, i32, i32, i32
  }
  func.func @transform_1(%arg0: i32, %arg1: i32) -> (i32, i32, i32, i32) {
    %c1_i32 = arith.constant 1 : i32
    %0 = arith.addi %arg1, %c1_i32 : i32
    %c2_i32 = arith.constant 2 : i32
    %1 = arith.muli %0, %c2_i32 : i32
    %c0_i32 = arith.constant 0 : i32
    %c0_i32_0 = arith.constant 0 : i32
    %c0_i32_1 = arith.constant 0 : i32
    return %arg0, %1, %c0_i32, %c0_i32_0 : i32, i32, i32, i32
  }
  func.func @transform_2(%arg0: i32, %arg1: i32) -> (i32, i32, i32) {
    %c0_i32 = arith.constant 0 : i32
    %c0_i32_0 = arith.constant 0 : i32
    %c0_i32_1 = arith.constant 0 : i32
    %c0_i32_2 = arith.constant 0 : i32
    return %c0_i32, %c0_i32_0, %c0_i32_1 : i32, i32, i32
  }
  func.func @transform_3(%arg0: i32, %arg1: i32) -> (i32, i32) {
    %c0_i32 = arith.constant 0 : i32
    %c0_i32_0 = arith.constant 0 : i32
    %c0_i32_1 = arith.constant 0 : i32
    return %c0_i32, %c0_i32_0 : i32, i32
  }
  func.func @transform_4(%arg0: i32, %arg1: i32) -> (i32, i32) {
    %c0_i32 = arith.constant 0 : i32
    %c0_i32_0 = arith.constant 0 : i32
    %c0_i32_1 = arith.constant 0 : i32
    return %c0_i32, %c0_i32_0 : i32, i32
  }
  func.func @transform_5(%arg0: i32, %arg1: i32) -> (i32, i32) {
    %c0_i32 = arith.constant 0 : i32
    %c0_i32_0 = arith.constant 0 : i32
    %c0_i32_1 = arith.constant 0 : i32
    return %c0_i32, %c0_i32_0 : i32, i32
  }
  func.func @transform_6(%arg0: i32, %arg1: i32) -> (i32, i32, i32, i32) {
    %c0_i32 = arith.constant 0 : i32
    %c0_i32_0 = arith.constant 0 : i32
    %c0_i32_1 = arith.constant 0 : i32
    return %arg0, %arg1, %c0_i32, %c0_i32_0 : i32, i32, i32, i32
  }
}

</mosaic_0001>

<bundles_post_ra>
// kernel: tpu_custom_call.1
= control target key start
LH: loop header
LB: loop body
LE: loop exit
PB: predicated region body
PF: predicated region fallthrough
CT: control target
= control target key end

     0   :  { %11 = vsyncpa [#allocation4], 0  ;;  %s3220_s0 = inlined_call_operand.vmem [shape: f32[2,18,18,4], index: 0, kind: input, shape index: {}]   ;;  %s3221_s1 = inlined_call_operand.vmem [shape: f32[2,18,18,4], index: 1, kind: input, shape index: {}]   ;;  %s3222_s2 = inlined_call_operand.vmem [shape: f32[9,4,128], index: 2, kind: input, shape index: {}]   ;;  %s3223_s3 = inlined_call_operand.vmem [shape: f32[1,128], index: 3, kind: input, shape index: {}]   ;;  %s3224_s4 = inlined_call_operand.vmem [shape: f32[1,128], index: 4, kind: input, shape index: {}]   ;;  %s3225_s5 = inlined_call_operand.vmem [shape: f32[1,128], index: 5, kind: input, shape index: {}]   ;;  %s3226_s6 = inlined_call_operand.hbm [shape: f32[2,8,8,128], index: 6, kind: output, shape index: {}]  }
   0x1   :  { %13 = vsyncpa [#allocation4 + $0x1], 0  ;;  %s2779_s21 = smov 0   ;;  %s2781_s22 = smov 0  }
   0x2   :  { %s2783_s23 = smov 0   ;;  %s2785_s24 = smov 0  }
   0x3   :  { %s2787_s25 = smov 0   ;;  %s2789_s26 = smov 0  }
   0x4   :  { %s2791_s27 = smov 0   ;;  %s2793_s28 = smov 0  }
   0x5 LB: > { %s2174_s29 = sadd.s32 4294967295, %s2738_s28   ;;  %s2175_s30 = sadd.s32 4294967294, %s2738_s28   ;;  %s2738_s28 = sphi %s2793_s28, %s19_s28   ;;  %s2734_s27 = sphi %s2791_s27, %s3235_s27   ;;  %s2730_s26 = sphi %s2789_s26, %s3234_s26   ;;  %s2726_s25 = sphi %s2787_s25, %s3233_s25   ;;  %s2722_s24 = sphi %s2785_s24, %s3232_s24   ;;  %s2718_s23 = sphi %s2783_s23, %s3231_s23   ;;  %s2714_s22 = sphi %s2781_s22, %s3230_s22   ;;  %s2710_s21 = sphi %s2779_s21, %s3229_s21  }
   0x6   : > { %s28_s7 = sadd.s32 1, %s2730_s26  ;;  %s31_s8 = sadd.s32 1, %s2734_s27 }
   0x7   : > { %p29_p0 = scmp.ge.s32.totalorder %s28_s7, 4  ;;  %p194_p1 = scmp.ne.s32.totalorder %s2718_s23, %s2714_s22 }
   0x8   : > { %p195_p2 = scmp.eq.s32.totalorder %s2174_s29, 7  ;;  %p200_p5 = scmp.ne.s32.totalorder %s2714_s22, %s2710_s21 }
   0x9   : > { %s3237_s7 = smov (%p29_p0, %s28_s7), 0  ;;  %s3239_s8 = smov (!%p29_p0, %s31_s8), %s2734_s27 }
   0xa   : > { %s180_s9 = ssub.s32 %s2730_s26, %s3237_s7  ;;  %p2830_p3 = por %p195_p2, %p194_p1 }
   0xb   : > { %p33_p4 = scmp.ge.s32.totalorder %s3239_s8, 2  ;;  %p201_p6 = scmp.eq.s32.totalorder %s2175_s30, 7 }
   0xc   : > { %p2180_p7 = scmp.ge.s32.totalorder %s2738_s28, 1  ;;  %p273_p9 = scmp.lt.s32.totalorder %s2738_s28, 9 }
   0xd   : > { %s3241_s8 = smov (%p33_p4, %s3239_s8), 0  ;;  %p2839_p8 = por %p201_p6, %p200_p5 }
   0xe   : > { %s179_s12 = ssub.s32 %s2734_s27, %s3241_s8  ;;  %s184_s13 = sadd.s32 1, %s2718_s23 }
   0xf   : > { %s181_s14 = sor.u32 %s180_s9, %s179_s12  ;;  %p274_p10 = pnand %p2180_p7, %p273_p9 }
  0x10   : > { %p182_p11 = scmp.eq.s32.totalorder %s181_s14, 0  ;;  %v2187_v0 = vld [vmem:[%s3222_s2 + $0x4] sm:$0xf] (!%p274_p10)  ;;  %vm444_vm0 = vcmask (!%p274_p10), 1043456   ;;  %v2856_v1 = vld [vmem:[%s3222_s2 + $0x10] sm:$0xf] (!%p274_p10) }
  0x11   : > { %277 = sbr.rel (%p274_p10) target bundleno = 388 (0x184), region = 44  ;;  %s2182_s20 = sshll.u32 (!%p274_p10), %s2722_s24, 2  ;;  %2375 = vmatprep.subr.msk.mxu1 (!%p274_p10), %vm444_vm0, %v2187_v0  ;;  %2431 = vmatprep.subr.msk.mxu0 (!%p274_p10), %vm444_vm0, %v2856_v1  ;;  %v409_v2 = vld [vmem:[%s3222_s2] sm:$0xf] (!%p274_p10)  ;;  %v2236_v3 = vld [vmem:[%s3222_s2 + $0x14] sm:$0xf] (!%p274_p10) }
  0x12   : > { %s2848_s15 = scalar_select %p182_p11, %s2718_s23, %s184_s13  }
  0x13   : > { %p331_p12 = scmp.lt.s32.totalorder (!%p274_p10), %s2726_s25, 1  ;;  %p333_p13 = scmp.lt.s32.totalorder (!%p274_p10), %s2182_s20, 17  ;;  %2376 = vmatpush3.msk.msra.mxu1 (!%p274_p10), %vm444_vm0, %v2187_v0  ;;  %2432 = vmatpush3.msk.msra.mxu0 (!%p274_p10), %vm444_vm0, %v2856_v1  ;;  %vm374_vm1 = vcmask (!%p274_p10), 31744   ;;  %vm377_vm2 = vcmask (!%p274_p10), 25600   ;;  %v2246_v24 = vld [vmem:[%s3222_s2 + $0x18] sm:$0xf] (!%p274_p10) }
  0x14   : > { %2389 = vmatprep.subr.msk.mxu1 (!%p274_p10), %vm444_vm0, %v409_v2  ;;  %2445 = vmatprep.subr.msk.mxu0 (!%p274_p10), %vm444_vm0, %v2236_v3  ;;  %s2293_s17 = sadd.s32 (!%p274_p10), 4, %s2182_s20  ;;  %v2206_v25 = vld [vmem:[%s3222_s2 + $0x8] sm:$0xf] (!%p274_p10)  ;;  %v2256_v33 = vld [vmem:[%s3222_s2 + $0x1c] sm:$0xf] (!%p274_p10)  ;;  %vm1898_vm8 = vcmask (!%p274_p10), 1041408  }
  0x15   : > { %p351_p0 = scmp.lt.s32.totalorder (!%p274_p10), %s2293_s17, 17  ;;  %v2216_v43 = vld [vmem:[%s3222_s2 + $0xc] sm:$0xf] (!%p274_p10)  ;;  %v2266_v49 = vld [vmem:[%s3222_s2 + $0x20] sm:$0xf] (!%p274_p10)  ;;  %vm2027_vm12 = vcmask (!%p274_p10), 1041409  }
  0x16   : > { %vm2029_vm13 = vcmask (!%p274_p10), 1042434   ;;  %vm2031_vm14 = vcmask (!%p274_p10), 1043459   ;;  %vm2033_vm15 = vcmask (!%p274_p10), 1044484  }
  0x18   : > { %s2873_s13 = scalar_select %p331_p12, %s2726_s25, 1 }
  0x19   : > { %s334_s14 = scalar_select %p333_p13, %s2182_s20, 17 }
  0x1a   : > { %s2568_s16 = smul.u32 54, %s2873_s13  ;;  %s3243_s17 = smov (!%p351_p0, %s2293_s17), 17 }
  0x1b   : > { %s2567_s18 = smul.u32 3, %s334_s14 }
  0x1c   : > { %s2569_s20 = smul.u32 3, %s3243_s17 }
  0x1d   : > { %s337_s19 = sadd.s32 %s2568_s16, %s2567_s18 }
  0x1e   : > { %s2183_s29 = sshll.u32 %s337_s19, 3  ;;  %s355_s14 = sadd.s32 %s2569_s20, %s2568_s16 }
  0x1f   : > { %s339_s12 = scalar_lea.vmem %s3220_s0, %s2183_s29  ;;  %s2186_s18 = sshll.u32 %s355_s14, 3 }
  0x20   : > { %v362_v4 = vld [vmem:[%s339_s12] sm:$0xff]  ;;  %v363_v5 = vld [vmem:[%s339_s12 + $0x8] sm:$0xff]  ;;  %v365_v6 = vld [vmem:[%s339_s12 + $0x18] sm:$0xff]  ;;  %s2900_s29 = scalar_lea.vmem %s3221_s1, %s2186_s18  ;;  %s322_s20 = sand.u32 1, %s2714_s22  }
  0x21   : > { %375 = vst.msk [vmem:[#allocation2] sm:$0xff] %vm374_vm1, %v362_v4  ;;  %376 = vst.msk [vmem:[#allocation2 + $0x8] sm:$0xff] %vm374_vm1, %v363_v5  ;;  %v366_v7 = vld [vmem:[%s339_s12 + $0x20] sm:$0xff]  ;;  %v364_v8 = vld [vmem:[%s339_s12 + $0x10] sm:$0x3]  ;;  %s2181_s14 = sshll.u32 %s322_s20, 4 }
  0x22   : > { %379 = vst.msk [vmem:[#allocation2 + $0x18] sm:$0xff] %vm374_vm1, %v365_v6  ;;  %v367_v9 = vld [vmem:[%s339_s12 + $0x28] sm:$0x3]  ;;  %380 = vst.msk [vmem:[#allocation2 + $0x20] sm:$0xff] %vm374_vm1, %v366_v7  ;;  %v368_v10 = vld [vmem:[%s339_s12 + $0x30] sm:$0xff]  ;;  %s2280_s18 = sshll.u32 %s2722_s24, 1 }
  0x23   : > { %378 = vst.msk [vmem:[#allocation2 + $0x10] sm:$0x3] %vm377_vm2, %v364_v8  ;;  %381 = vst.msk [vmem:[#allocation2 + $0x28] sm:$0x3] %vm377_vm2, %v367_v9  ;;  %v369_v11 = vld [vmem:[%s339_s12 + $0x38] sm:$0xff]  ;;  %v371_v13 = vld [vmem:[%s339_s12 + $0x48] sm:$0xff] }
  0x24   : > { %v370_v12 = vld [vmem:[%s339_s12 + $0x40] sm:$0x3]  ;;  %382 = vst.msk [vmem:[#allocation2 + $0x30] sm:$0xff] %vm374_vm1, %v368_v10  ;;  %383 = vst.msk [vmem:[#allocation2 + $0x38] sm:$0xff] %vm374_vm1, %v369_v11  ;;  %v372_v14 = vld [vmem:[%s339_s12 + $0x50] sm:$0xff]  ;;  %s2281_s19 = sshll.u32 %s2726_s25, 3 }
  0x25   : > { %384 = vst.msk [vmem:[#allocation2 + $0x40] sm:$0x3] %vm377_vm2, %v370_v12  ;;  %v373_v15 = vld [vmem:[%s339_s12 + $0x58] sm:$0x3]  ;;  %v388_v16 = vld [vmem:[%s2900_s29] sm:$0xff]  ;;  %v389_v17 = vld [vmem:[%s2900_s29 + $0x8] sm:$0xff] }
  0x26   : > { %385 = vst.msk [vmem:[#allocation2 + $0x48] sm:$0xff] %vm374_vm1, %v371_v13  ;;  %386 = vst.msk [vmem:[#allocation2 + $0x50] sm:$0xff] %vm374_vm1, %v372_v14  ;;  %v390_v18 = vld [vmem:[%s2900_s29 + $0x10] sm:$0x3]  ;;  %v391_v31 = vld [vmem:[%s2900_s29 + $0x18] sm:$0xff]  ;;  %v1818_v13 = vlaneseq  ;;  %s324_s17 = scalar_lea.vmem [#allocation3], %s2181_s14 }
  0x27   : > { %387 = vst.msk [vmem:[#allocation2 + $0x58] sm:$0x3] %vm377_vm2, %v373_v15  ;;  %397 = vst.msk [vmem:[#allocation2 + $0x70] sm:$0x3] %vm377_vm2, %v390_v18  ;;  %v392_v32 = vld [vmem:[%s2900_s29 + $0x20] sm:$0xff]  ;;  %s2068_s25 = sshll.u32 %s324_s17, 4  ;;  %s3162_s25 = int_to_ptr.vmem [resolvable:$true] %s2068_s25 }
  0x28   : > { %v410_v19 = vld [vmem:[#allocation2 + $0x1] sm:$0xff]  ;;  %395 = vst.msk [vmem:[#allocation2 + $0x60] sm:$0xff] %vm374_vm1, %v388_v16  ;;  %396 = vst.msk [vmem:[#allocation2 + $0x68] sm:$0xff] %vm374_vm1, %v389_v17  ;;  %v3076_v4 = vld [vmem:[%s3223_s3] ss:$0 sm:$0xff]  ;;  %s3168_s9 = scalar_lea.sflag [#allocation4], %s322_s20 }
  0x29   : > { %2377 = vmatprep.mubr.msk.f32.mxu1 %vm374_vm1, %v410_v19  ;;  %v986_v20 = vld [vmem:[#allocation2 + $0x19] sm:$0xff]  ;;  %398 = vst.msk [vmem:[#allocation2 + $0x78] sm:$0xff] %vm374_vm1, %v391_v31  ;;  %399 = vst.msk [vmem:[#allocation2 + $0x80] sm:$0xff] %vm374_vm1, %v392_v32  ;;  %v393_v34 = vld [vmem:[%s2900_s29 + $0x28] sm:$0x3]  ;;  %s2065_s29 = sadd.s32 %s2281_s19, %s2280_s18  ;;  %s2644_s12 = scalar_lea.vmem %s3162_s25, 256 }
  0x2a   : > { %v411_v21 = vld [vmem:[#allocation2 + $0x9] sm:$0xff]  ;;  %v987_v22 = vld [vmem:[#allocation2 + $0x21] sm:$0xff]  ;;  %2433 = vmatprep.mubr.msk.f32.mxu0 %vm374_vm1, %v986_v20  ;;  %400 = vst.msk [vmem:[#allocation2 + $0x88] sm:$0x3] %vm377_vm2, %v393_v34  ;;  %v403_v41 = vld [vmem:[#allocation2 + $0x18] sm:$0xff]  ;;  %vm2039_vm2 = vcmask 1047559   ;;  %p2645_p1 = scmp.ne.s32.totalorder %s3162_s25, %s2644_s12 }
  0x2b   : > { %2378 = vmatmul.mubr.msk.f32.vlgmr.msra.gmra.mrb[0].mxu1 %vm374_vm1, %v411_v21  ;;  %v2911_v23 = vld [vmem:[#allocation2 + $0x31] sm:$0xff]  ;;  %2434 = vmatmul.mubr.msk.f32.vlgmr.msra.gmra.mrb[0].mxu0 %vm374_vm1, %v987_v22  ;;  %v2927_v27 = vld [vmem:[#allocation2 + $0x1a] sm:$0xff]  ;;  %v2938_v28 = vld [vmem:[#allocation2 + $0x22] sm:$0xff]  ;;  %v2740_v11 = vmov 1983009808   ;;  %s2282_s24 = sshll.u32 %s2065_s29, 7 }
  0x2c   : > { %2390 = vmatpush3.msk.msra.mxu1 %vm444_vm0, %v409_v2  ;;  %2446 = vmatpush3.msk.msra.mxu0 %vm444_vm0, %v2236_v3  ;;  %v2923_v26 = vld [vmem:[#allocation2 + $0x39] sm:$0xff]  ;;  %v402_v39 = vld [vmem:[#allocation2 + $0x8] sm:$0xff]  ;;  %v405_v46 = vld [vmem:[#allocation2 + $0x30] sm:$0xff]  ;;  %v1816_v12 = vunpack.c.l.s4 %v2740_v11  ;;  %s3160_s30 = scalar_lea.hbm %s3226_s6, %s2282_s24  ;;  %p2646_p2 = pnand %p2645_p1, %p2830_p3 }
  0x2d   : > { %2380 = vmatprep.mubr.msk.f32.mxu1 %vm374_vm1, %v986_v20  ;;  %2436 = vmatprep.mubr.msk.f32.mxu0 %vm374_vm1, %v2911_v23  ;;  %v2940_v29 = vld [vmem:[#allocation2 + $0x49] sm:$0xff]  ;;  %v2942_v30 = vld [vmem:[#allocation2 + $0x32] sm:$0xff]  ;;  %v2964_v36 = vld [vmem:[#allocation2 + $0x3a] sm:$0xff]  ;;  %s2741_s14 = smov [#allocation3]  }
  0x2e   : > { %2459 = vmatprep.subr.msk.mxu0 %vm444_vm0, %v2246_v24  ;;  %2403 = vmatprep.subr.msk.mxu1 %vm444_vm0, %v2206_v25  ;;  %v2958_v35 = vld [vmem:[#allocation2 + $0x51] sm:$0xff]  ;;  %v401_v37 = vld [vmem:[#allocation2] sm:$0xff]  ;;  %v407_v48 = vld [vmem:[#allocation2 + $0x48] sm:$0xff]  ;;  %p2647_p4 = pneg %p2646_p2  ;;  %s2648_s18 = sshll.u32 %s2741_s14, 4  ;;  %s2649_s18 = int_to_ptr.vmem [resolvable:$false] %s2648_s18 }
  0x2f   : > { %2381 = vmatmul.mubr.msk.f32.gmra.mrb[2].mxu1 %vm374_vm1, %v987_v22  ;;  %2437 = vmatmul.mubr.msk.f32.gmra.mrb[2].mxu0 %vm374_vm1, %v2923_v26  ;;  %v2966_v38 = vld [vmem:[#allocation2 + $0x4a] sm:$0xff]  ;;  %v2976_v40 = vld [vmem:[#allocation2 + $0x52] sm:$0xff]  ;;  %v2978_v42 = vld [vmem:[#allocation2 + $0x62] sm:$0xff]  ;;  %s2650_s19 = scalar_lea.vmem %s2649_s18, 512  ;;  %p2651_p5 = scmp.lt.s32.totalorder %s3162_s25, %s2649_s18 }
  0x30   : > { %2383 = vmatprep.mubr.msk.f32.mxu1 %vm374_vm1, %v2911_v23  ;;  %2447 = vmatprep.mubr.msk.f32.mxu0 %vm374_vm1, %v2927_v27  ;;  %v404_v44 = vld [vmem:[#allocation2 + $0x20] sm:$0xff]  ;;  %v2990_v45 = vld [vmem:[#allocation2 + $0x6a] sm:$0xff]  ;;  %v406_v47 = vld [vmem:[#allocation2 + $0x38] sm:$0xff]  ;;  %p2652_p6 = scmp.lt.s32.totalorder %s2650_s19, %s2644_s12 }
  0x31   : > { %v408_v50 = vld [vmem:[#allocation2 + $0x50] sm:$0xff]  ;;  %v685_v51 = vld [vmem:[#allocation2 + $0x2] sm:$0xff]  ;;  %v1293_v55 = vld [vmem:[#allocation2 + $0x78] sm:$0xff] }
  0x32   : > { %v1291_v52 = vld [vmem:[#allocation2 + $0x60] sm:$0xff]  ;;  %v686_v53 = vld [vmem:[#allocation2 + $0xa] sm:$0xff]  ;;  %p2653_p7 = por %p2652_p6, %p2651_p5 }
  0x33   : > { %2384 = vmatmul.mubr.msk.f32.gmra.mrb[4].mxu1 %vm374_vm1, %v2923_v26  ;;  %2448 = vmatmul.mubr.msk.f32.vlgmr.msra.gmra.mrb[0].mxu0 %vm374_vm1, %v2938_v28  ;;  %v1292_v54 = vld [vmem:[#allocation2 + $0x68] sm:$0xff]  ;;  %v1294_v56 = vld [vmem:[#allocation2 + $0x80] sm:$0xff] }
  0x34   : > { %2386 = vmatprep.mubr.msk.f32.mxu1 %vm374_vm1, %v2940_v29  ;;  %2460 = vmatpush3.msk.msra.mxu0 %vm444_vm0, %v2246_v24  ;;  %v1441_v57 = vld [vmem:[#allocation2 + $0x61] sm:$0xff]  ;;  %v1442_v58 = vld [vmem:[#allocation2 + $0x69] sm:$0xff]  ;;  %v1443_v59 = vld [vmem:[#allocation2 + $0x79] sm:$0xff]  ;;  %v1817_v24 = vunpack.c.0.s8 %v1816_v12  ;;  %p2654_p9 = pnand %p2653_p7, %p2647_p4 }
  0x35   : > { %2450 = vmatprep.mubr.msk.f32.mxu0 %vm374_vm1, %v2942_v30  ;;  %2473 = vmatprep.subr.msk.mxu0 %vm444_vm0, %v2256_v33  ;;  %v1444_v60 = vld [vmem:[#allocation2 + $0x81] sm:$0xff]  ;;  %v3083_v17 = vld [vmem:[%s3224_s4] ss:$0 sm:$0xff] }
  0x36   : > { %v1593_v61 = vld [vmem:[#allocation2 + $0x7a] sm:$0xff]  ;;  %v1594_v62 = vld [vmem:[#allocation2 + $0x82] sm:$0xff] }
  0x37   : > { %2387 = vmatmul.mubr.msk.f32.gmra.mrb[6].mxu1 %vm374_vm1, %v2958_v35  ;;  %2451 = vmatmul.mubr.msk.f32.gmra.mrb[2].mxu0 %vm374_vm1, %v2964_v36 }
  0x38   : > { %2391 = vmatprep.mubr.msk.f32.mxu1 %vm374_vm1, %v401_v37  ;;  %2453 = vmatprep.mubr.msk.f32.mxu0 %vm374_vm1, %v2966_v38 }
  0x3b   : > { %2392 = vmatmul.mubr.msk.f32.vlgmr.msra.gmra.mrb[0].mxu1 %vm374_vm1, %v402_v39  ;;  %2454 = vmatmul.mubr.msk.f32.gmra.mrb[4].mxu0 %vm374_vm1, %v2976_v40 }
  0x3c   : > { %2404 = vmatpush3.msk.msra.mxu1 %vm444_vm0, %v2206_v25  ;;  %2394 = vmatprep.mubr.msk.f32.mxu1 %vm374_vm1, %v403_v41  ;;  %v1819_v25 = vshrl.u32 %v1818_v13, 7 }
  0x3d   : > { %2456 = vmatprep.mubr.msk.f32.mxu0 %vm374_vm1, %v2978_v42  ;;  %2417 = vmatprep.subr.msk.mxu1 %vm444_vm0, %v2216_v43 }
  0x3f   : > { %2395 = vmatmul.mubr.msk.f32.gmra.mrb[2].mxu1 %vm374_vm1, %v404_v44  ;;  %2457 = vmatmul.mubr.msk.f32.gmra.mrb[6].mxu0 %vm374_vm1, %v2990_v45 }
  0x40   : > { %2397 = vmatprep.mubr.msk.f32.mxu1 %vm374_vm1, %v405_v46  ;;  %2461 = vmatprep.mubr.msk.f32.mxu0 %vm374_vm1, %v405_v46 }
  0x43   : > { %2398 = vmatmul.mubr.msk.f32.gmra.mrb[4].mxu1 %vm374_vm1, %v406_v47  ;;  %2462 = vmatmul.mubr.msk.f32.vlgmr.msra.gmra.mrb[0].mxu0 %vm374_vm1, %v406_v47 }
  0x44   : > { %2400 = vmatprep.mubr.msk.f32.mxu1 %vm374_vm1, %v407_v48  ;;  %2474 = vmatpush3.msk.msra.mxu0 %vm444_vm0, %v2256_v33  ;;  %v3091_v33 = vld [vmem:[%s3225_s5] ss:$0 sm:$0xff] }
  0x45   : > { %2464 = vmatprep.mubr.msk.f32.mxu0 %vm374_vm1, %v407_v48  ;;  %2487 = vmatprep.subr.msk.mxu0 %vm444_vm0, %v2266_v49 }
  0x47   : > { %2401 = vmatmul.mubr.msk.f32.gmra.mrb[6].mxu1 %vm374_vm1, %v408_v50  ;;  %2465 = vmatmul.mubr.msk.f32.gmra.mrb[2].mxu0 %vm374_vm1, %v408_v50 }
  0x48   : > { %2405 = vmatprep.mubr.msk.f32.mxu1 %vm374_vm1, %v685_v51  ;;  %2467 = vmatprep.mubr.msk.f32.mxu0 %vm374_vm1, %v1291_v52 }
  0x4b   : > { %2406 = vmatmul.mubr.msk.f32.vlgmr.msra.gmra.mrb[0].mxu1 %vm374_vm1, %v686_v53  ;;  %2468 = vmatmul.mubr.msk.f32.gmra.mrb[4].mxu0 %vm374_vm1, %v1292_v54 }
  0x4c   : > { %2418 = vmatpush3.msk.msra.mxu1 %vm444_vm0, %v2216_v43  ;;  %2408 = vmatprep.mubr.msk.f32.mxu1 %vm374_vm1, %v2927_v27 }
  0x4d   : > { %2470 = vmatprep.mubr.msk.f32.mxu0 %vm374_vm1, %v1293_v55  ;;  %2501 = vmatprep.subr.msk.mxu1 %vm444_vm0, %v2856_v1 }
  0x4f   : > { %2409 = vmatmul.mubr.msk.f32.gmra.mrb[2].mxu1 %vm374_vm1, %v2938_v28  ;;  %2471 = vmatmul.mubr.msk.f32.gmra.mrb[6].mxu0 %vm374_vm1, %v1294_v56 }
  0x50   : > { %2411 = vmatprep.mubr.msk.f32.mxu1 %vm374_vm1, %v2942_v30  ;;  %2475 = vmatprep.mubr.msk.f32.mxu0 %vm374_vm1, %v2911_v23 }
  0x53   : > { %2412 = vmatmul.mubr.msk.f32.gmra.mrb[4].mxu1 %vm374_vm1, %v2964_v36  ;;  %2476 = vmatmul.mubr.msk.f32.vlgmr.msra.gmra.mrb[0].mxu0 %vm374_vm1, %v2923_v26 }
  0x54   : > { %2414 = vmatprep.mubr.msk.f32.mxu1 %vm374_vm1, %v2966_v38  ;;  %2488 = vmatpush3.msk.msra.mxu0 %vm444_vm0, %v2266_v49 }
  0x55   : > { %2478 = vmatprep.mubr.msk.f32.mxu0 %vm374_vm1, %v2940_v29 }
  0x57   : > { %2415 = vmatmul.mubr.msk.f32.gmra.mrb[6].mxu1 %vm374_vm1, %v2976_v40  ;;  %2479 = vmatmul.mubr.msk.f32.gmra.mrb[2].mxu0 %vm374_vm1, %v2958_v35 }
  0x58   : > { %2419 = vmatprep.mubr.msk.f32.mxu1 %vm374_vm1, %v403_v41  ;;  %2481 = vmatprep.mubr.msk.f32.mxu0 %vm374_vm1, %v1441_v57  ;;  %v3096_v41 = vsub.s32 %v1817_v24, %v1819_v25 }
  0x5b   : > { %2420 = vmatmul.mubr.msk.f32.vlgmr.msra.gmra.mrb[0].mxu1 %vm374_vm1, %v404_v44  ;;  %2482 = vmatmul.mubr.msk.f32.gmra.mrb[4].mxu0 %vm374_vm1, %v1442_v58 }
  0x5c   : > { %2502 = vmatpush3.msk.msra.mxu1 %vm444_vm0, %v2856_v1  ;;  %2422 = vmatprep.mubr.msk.f32.mxu1 %vm374_vm1, %v405_v46  ;;  %vm2035_vm0 = vcmask 1045509  }
  0x5d   : > { %2484 = vmatprep.mubr.msk.f32.mxu0 %vm374_vm1, %v1443_v59 }
  0x5f   : > { %2423 = vmatmul.mubr.msk.f32.gmra.mrb[2].mxu1 %vm374_vm1, %v406_v47  ;;  %2485 = vmatmul.mubr.msk.f32.gmra.mrb[6].mxu0 %vm374_vm1, %v1444_v60 }
  0x60   : > { %2425 = vmatprep.mubr.msk.f32.mxu1 %vm374_vm1, %v407_v48  ;;  %2489 = vmatprep.mubr.msk.f32.mxu0 %vm374_vm1, %v2942_v30 }
  0x63   : > { %2426 = vmatmul.mubr.msk.f32.gmra.mrb[4].mxu1 %vm374_vm1, %v408_v50  ;;  %2490 = vmatmul.mubr.msk.f32.vlgmr.msra.gmra.mrb[0].mxu0 %vm374_vm1, %v2964_v36 }
  0x64   : > { %2428 = vmatprep.mubr.msk.f32.mxu1 %vm374_vm1, %v1291_v52  ;;  %2492 = vmatprep.mubr.msk.f32.mxu0 %vm374_vm1, %v2966_v38 }
  0x67   : > { %2429 = vmatmul.mubr.msk.f32.gmra.mrb[6].mxu1 %vm374_vm1, %v1292_v54  ;;  %2493 = vmatmul.mubr.msk.f32.gmra.mrb[2].mxu0 %vm374_vm1, %v2976_v40 }
  0x68   : > { %2439 = vmatprep.mubr.msk.f32.mxu1 %vm374_vm1, %v2940_v29  ;;  %2495 = vmatprep.mubr.msk.f32.mxu0 %vm374_vm1, %v2978_v42 }
  0x6b   : > { %2440 = vmatmul.mubr.msk.f32.vlgmr.msra.gmra.mrb[4].mxu1 %vm374_vm1, %v2958_v35  ;;  %2496 = vmatmul.mubr.msk.f32.gmra.mrb[4].mxu0 %vm374_vm1, %v2990_v45 }
  0x6c   : > { %2442 = vmatprep.mubr.msk.f32.mxu1 %vm374_vm1, %v1441_v57  ;;  %2498 = vmatprep.mubr.msk.f32.mxu0 %vm374_vm1, %v1593_v61 }
  0x6f   : > { %2443 = vmatmul.mubr.msk.f32.gmra.mrb[6].mxu1 %vm374_vm1, %v1442_v58  ;;  %2499 = vmatmul.mubr.msk.f32.gmra.mrb[6].mxu0 %vm374_vm1, %v1594_v62  ;;  %vm2037_vm1 = vcmask 1046534  }
 0x12e   : > { %v2421_v63 = vpop.f32.mrb[0].mxu1 }
 0x12f   : > { %v939_v0 = vpop.f32.mrb[1].mxu1 }
 0x132   : > { %v2424_v1 = vpop.f32.mrb[2].mxu1 }
 0x133   : > { %v949_v2 = vpop.f32.mrb[3].mxu1 }
 0x136   : > { %v2491_v3 = vpop.f32.mrb[0].mxu0 }
 0x137   : > { %v2503_v5 = vadd.f32 %v2491_v3, %v2421_v63  ;;  %v1690_v6 = vpop.f32.mrb[1].mxu0 }
 0x138   : > { %v2504_v7 = vadd.f32 %v1690_v6, %v939_v0 }
 0x139   : > { %v1745_v8 = vadd.f32 %v2503_v5, %v3076_v4 }
 0x13a   : > { %v1744_v9 = vadd.f32 %v2504_v7, %v3076_v4  ;;  %v2494_v10 = vpop.f32.mrb[2].mxu0 }
 0x13b   : > { %vm1753_vm3 = vcmp.gt.f32.partialorder %v1745_v8, 0.0  ;;  %v1761_v14 = vmul.f32 0.2, %v1745_v8  ;;  %v2505_v15 = vadd.f32 %v2494_v10, %v2424_v1  ;;  %v1700_v16 = vpop.f32.mrb[3].mxu0 }
 0x13c   : > { %vm1752_vm4 = vcmp.gt.f32.partialorder %v1744_v9, 0.0  ;;  %v1760_v18 = vmul.f32 0.2, %v1744_v9  ;;  %v2506_v19 = vadd.f32 %v1700_v16, %v949_v2 }
 0x13d   : > { %v1769_v20 = vsel %vm1753_vm3, %v1745_v8, %v1761_v14  ;;  %v1747_v21 = vadd.f32 %v2505_v15, %v3076_v4 }
 0x13e   : > { %v2441_v22 = vpop.f32.mrb[4].mxu1  ;;  %v1768_v23 = vsel %vm1752_vm4, %v1744_v9, %v1760_v18  ;;  %v1746_v26 = vadd.f32 %v2506_v19, %v3076_v4  ;;  %v2497_v27 = vpop.f32.mrb[4].mxu0  ;;  %v1784_v29 = vmul.f32 %v3083_v17, %v1769_v20 }
 0x13f   : > { %v1109_v28 = vpop.f32.mrb[5].mxu1  ;;  %vm1755_vm5 = vcmp.gt.f32.partialorder %v1747_v21, 0.0  ;;  %v1763_v30 = vmul.f32 0.2, %v1747_v21  ;;  %v2507_v31 = vadd.f32 %v2497_v27, %v2441_v22  ;;  %v1710_v32 = vpop.f32.mrb[5].mxu0  ;;  %v1783_v36 = vmul.f32 %v3083_v17, %v1768_v23 }
 0x140   : > { %vm1754_vm6 = vcmp.gt.f32.partialorder %v1746_v26, 0.0  ;;  %v1762_v34 = vmul.f32 0.2, %v1746_v26  ;;  %v2508_v35 = vadd.f32 %v1710_v32, %v1109_v28  ;;  %v1799_v45 = vadd.f32 %v3091_v33, %v1784_v29 }
 0x141   : > { %v1771_v37 = vsel %vm1755_vm5, %v1747_v21, %v1763_v30  ;;  %v1749_v38 = vadd.f32 %v2507_v31, %v3076_v4  ;;  %v1798_v53 = vadd.f32 %v3091_v33, %v1783_v36 }
 0x142   : > { %v2444_v39 = vpop.f32.mrb[6].mxu1  ;;  %v1786_v40 = vmul.f32 %v3083_v17, %v1771_v37  ;;  %v1770_v42 = vsel %vm1754_vm6, %v1746_v26, %v1762_v34  ;;  %v2500_v43 = vpop.f32.mrb[6].mxu0  ;;  %v1748_v51 = vadd.f32 %v2508_v35, %v3076_v4 }
 0x143   : > { %v1119_v44 = vpop.f32.mrb[7].mxu1  ;;  %v1785_v46 = vmul.f32 %v3083_v17, %v1770_v42  ;;  %v1765_v47 = vmul.f32 0.2, %v1749_v38  ;;  %v2509_v48 = vadd.f32 %v2500_v43, %v2444_v39  ;;  %v1720_v49 = vpop.f32.mrb[7].mxu0  ;;  %vm1757_vm7 = vcmp.gt.f32.partialorder %v1749_v38, 0.0 }
 0x144   : > { %v1801_v50 = vadd.f32 %v3091_v33, %v1786_v40  ;;  %v2510_v52 = vadd.f32 %v1720_v49, %v1119_v44  ;;  %vm1756_vm9 = vcmp.gt.f32.partialorder %v1748_v51, 0.0  ;;  %v1764_v0 = vmul.f32 0.2, %v1748_v51 }
 0x145   : > { %v1800_v54 = vadd.f32 %v3091_v33, %v1785_v46  ;;  %v1751_v55 = vadd.f32 %v2509_v48, %v3076_v4  ;;  %v1773_v58 = vsel %vm1757_vm7, %v1749_v38, %v1765_v47 }
 0x146   : > { %v1807_v56 = vmax.f32 %v1799_v45, %v1801_v50  ;;  %v1788_v5 = vmul.f32 %v3083_v17, %v1773_v58  ;;  %v1772_v18 = vsel %vm1756_vm9, %v1748_v51, %v1764_v0  ;;  %v1750_v22 = vadd.f32 %v2510_v52, %v3076_v4 }
 0x147   : > { %v1806_v57 = vmax.f32 %v1798_v53, %v1800_v54  ;;  %v1767_v61 = vmul.f32 0.2, %v1751_v55  ;;  %vm1759_vm10 = vcmp.gt.f32.partialorder %v1751_v55, 0.0  ;;  %v1787_v34 = vmul.f32 %v3083_v17, %v1772_v18 }
 0x148   : > { %v1831_v59 = vcombine.high %v1807_v56, %v1807_v56  ;;  %v1838_v60 = vrot.slane %v1807_v56, %v3096_v41  ;;  %v1803_v32 = vadd.f32 %v3091_v33, %v1788_v5  ;;  %vm1758_vm11 = vcmp.gt.f32.partialorder %v1750_v22, 0.0 }
 0x149   : > { %v1814_v62 = vcombine.high %v1806_v57, %v1806_v57  ;;  %v1821_v63 = vrot.slane %v1806_v57, %v3096_v41  ;;  %v1775_v13 = vsel %vm1759_vm10, %v1751_v55, %v1767_v61  ;;  %v1802_v47 = vadd.f32 %v3091_v33, %v1787_v34 }
 0x14a   : > { %v1845_v1 = vrot.slane %v1831_v59, %v3096_v41  ;;  %v1846_v2 = vcombine.high %v1838_v60, %v1838_v60  ;;  %v1927_v3 = vsel %vm1898_vm8, %v1838_v60, -inf  ;;  %v1790_v26 = vmul.f32 %v3083_v17, %v1775_v13 }
 0x14b   : > { %v1928_v6 = vrot.slane %v1927_v3, 4  ;;  %v1828_v7 = vrot.slane %v1814_v62, %v3096_v41  ;;  %v1829_v8 = vcombine.high %v1821_v63, %v1821_v63  ;;  %v1899_v9 = vsel %vm1898_vm8, %v1821_v63, -inf }
 0x14c   : > { %v1934_v10 = vsel %vm1898_vm8, %v1846_v2, -inf  ;;  %v1941_v11 = vsel %vm1898_vm8, %v1845_v1, -inf  ;;  %v1900_v12 = vrot.slane %v1899_v9, 4  ;;  %v1847_v23 = vcombine.high %v1845_v1, %v1845_v1 }
 0x14d   : > { %v1929_v14 = vmax.f32 %v1927_v3, %v1928_v6  ;;  %v1935_v15 = vrot.slane %v1934_v10, 4  ;;  %v1830_v16 = vcombine.high %v1828_v7, %v1828_v7  ;;  %v1906_v20 = vsel %vm1898_vm8, %v1829_v8, -inf }
 0x14e   : > { %v1901_v19 = vmax.f32 %v1899_v9, %v1900_v12  ;;  %v1913_v21 = vsel %vm1898_vm8, %v1828_v7, -inf  ;;  %v1942_v25 = vrot.slane %v1941_v11, 4  ;;  %v1907_v28 = vrot.slane %v1906_v20, 4 }
 0x14f   : > { %v1936_v24 = vmax.f32 %v1934_v10, %v1935_v15  ;;  %v1930_v27 = vrot.slane %v1929_v14, 2  ;;  %v1914_v29 = vrot.slane %v1913_v21, 4  ;;  %v1920_v30 = vsel %vm1898_vm8, %v1830_v16, -inf }
 0x150   : > { %v1902_v31 = vrot.slane %v1901_v19, 2  ;;  %v1908_v36 = vmax.f32 %v1906_v20, %v1907_v28  ;;  %v1921_v38 = vrot.slane %v1920_v30, 4  ;;  %v1943_v4 = vmax.f32 %v1941_v11, %v1942_v25 }
 0x151   : > { %v1937_v35 = vrot.slane %v1936_v24, 2  ;;  %v1915_v37 = vmax.f32 %v1913_v21, %v1914_v29  ;;  %v1948_v39 = vsel %vm1898_vm8, %v1847_v23, -inf  ;;  %v1805_v40 = vadd.f32 %v3091_v33, %v1790_v26 }
 0x152   : > { %v1931_v42 = vmax.f32 %v1929_v14, %v1930_v27  ;;  %v1909_v43 = vrot.slane %v1908_v36, 2  ;;  %v1922_v45 = vmax.f32 %v1920_v30, %v1921_v38  ;;  %v1903_v46 = vmax.f32 %v1901_v19, %v1902_v31 }
 0x153   : > { %v1916_v44 = vrot.slane %v1915_v37, 2  ;;  %v1809_v48 = vmax.f32 %v1803_v32, %v1805_v40  ;;  %v1766_v49 = vmul.f32 0.2, %v1750_v22  ;;  %v1938_v50 = vmax.f32 %v1936_v24, %v1937_v35 }
 0x154   : > { %v1949_v51 = vrot.slane %v1948_v39, 4  ;;  %v1910_v52 = vmax.f32 %v1908_v36, %v1909_v43  ;;  %v1923_v53 = vrot.slane %v1922_v45, 2  ;;  %v1944_v54 = vrot.slane %v1943_v4, 2 }
 0x155   : > { %v1865_v55 = vcombine.high %v1809_v48, %v1809_v48  ;;  %v1872_v56 = vrot.slane %v1809_v48, %v3096_v41  ;;  %v1774_v57 = vsel %vm1758_vm11, %v1750_v22, %v1766_v49  ;;  %v1932_v58 = vrot.slane %v1931_v42, 1 }
 0x156   : > { %v1911_v59 = vrot.slane %v1910_v52, 1  ;;  %v1917_v60 = vmax.f32 %v1915_v37, %v1916_v44  ;;  %v1789_v61 = vmul.f32 %v3083_v17, %v1774_v57  ;;  %v1904_v62 = vrot.slane %v1903_v46, 1 }
 0x157   : > { %v1879_v63 = vrot.slane %v1865_v55, %v3096_v41  ;;  %v1880_v0 = vcombine.high %v1872_v56, %v1872_v56  ;;  %v1983_v1 = vsel %vm1898_vm8, %v1872_v56, -inf  ;;  %v1939_v2 = vrot.slane %v1938_v50, 1 }
 0x158   : > { %v1950_v3 = vmax.f32 %v1948_v39, %v1949_v51  ;;  %v1924_v5 = vmax.f32 %v1922_v45, %v1923_v53  ;;  %v1984_v6 = vrot.slane %v1983_v1, 4  ;;  %v1804_v10 = vadd.f32 %v3091_v33, %v1789_v61 }
 0x159   : > { %v1881_v7 = vcombine.high %v1879_v63, %v1879_v63  ;;  %v1990_v8 = vsel %vm1898_vm8, %v1880_v0, -inf  ;;  %v1997_v9 = vsel %vm1898_vm8, %v1879_v63, -inf  ;;  %v1945_v11 = vmax.f32 %v1943_v4, %v1944_v54 }
 0x15a   : > { %v1912_v17 = vmax.f32 %v1910_v52, %v1911_v59  ;;  %v1918_v12 = vrot.slane %v1917_v60, 1  ;;  %v1991_v13 = vrot.slane %v1990_v8, 4  ;;  %v1933_v14 = vmax.f32 %v1931_v42, %v1932_v58 }
 0x15b   : > { %v1905_v15 = vmax.f32 %v1903_v46, %v1904_v62  ;;  %v2004_v16 = vsel %vm1898_vm8, %v1881_v7, -inf  ;;  %v1808_v18 = vmax.f32 %v1802_v47, %v1804_v10  ;;  %v1925_v19 = vrot.slane %v1924_v5, 1 }
 0x15c   : > { %v1985_v20 = vmax.f32 %v1983_v1, %v1984_v6  ;;  %v1998_v21 = vrot.slane %v1997_v9, 4  ;;  %v1951_v22 = vrot.slane %v1950_v3, 2  ;;  %v2005_v23 = vrot.slane %v2004_v16, 4 }
 0x15d   : > { %v1848_v24 = vcombine.high %v1808_v18, %v1808_v18  ;;  %v1855_v33 = vrot.slane %v1808_v18, %v3096_v41  ;;  %v1940_v25 = vmax.f32 %v1938_v50, %v1939_v2  ;;  %v1919_v26 = vmax.f32 %v1917_v60, %v1918_v12 }
 0x15e   : > { %v2028_v27 = vsel %vm2027_vm12, %v1912_v17, %v1905_v15  ;;  %v1992_v28 = vmax.f32 %v1990_v8, %v1991_v13  ;;  %v1946_v29 = vrot.slane %v1945_v11, 1  ;;  %v1952_v34 = vmax.f32 %v1950_v3, %v1951_v22 }
 0x15f   : > { %v1862_v30 = vrot.slane %v1848_v24, %v3096_v41  ;;  %v1863_v31 = vcombine.high %v1855_v33, %v1855_v33  ;;  %v1955_v32 = vsel %vm1898_vm8, %v1855_v33, -inf  ;;  %v1926_v35 = vmax.f32 %v1924_v5, %v1925_v19 }
 0x160   : > { %v1986_v36 = vrot.slane %v1985_v20, 2  ;;  %v1999_v37 = vmax.f32 %v1997_v9, %v1998_v21  ;;  %v1956_v38 = vrot.slane %v1955_v32, 4  ;;  %v2006_v4 = vmax.f32 %v2004_v16, %v2005_v23 }
 0x161   : > { %v1864_v39 = vcombine.high %v1862_v30, %v1862_v30  ;;  %v1962_v40 = vsel %vm1898_vm8, %v1863_v31, -inf  ;;  %v1969_v42 = vsel %vm1898_vm8, %v1862_v30, -inf  ;;  %v1947_v45 = vmax.f32 %v1945_v11, %v1946_v29 }
 0x162   : > { %v1957_v43 = vmax.f32 %v1955_v32, %v1956_v38  ;;  %v1963_v44 = vrot.slane %v1962_v40, 4  ;;  %v2030_v41 = vsel %vm2029_vm13, %v1919_v26, %v2028_v27  ;;  %v1993_v46 = vrot.slane %v1992_v28, 2 }
 0x163   : > { %v1970_v47 = vrot.slane %v1969_v42, 4  ;;  %v1976_v48 = vsel %vm1898_vm8, %v1864_v39, -inf  ;;  %v1953_v49 = vrot.slane %v1952_v34, 1  ;;  %v1987_v50 = vmax.f32 %v1985_v20, %v1986_v36 }
 0x164   : > { %v1958_v51 = vrot.slane %v1957_v43, 2  ;;  %v1964_v52 = vmax.f32 %v1962_v40, %v1963_v44  ;;  %v1977_v53 = vrot.slane %v1976_v48, 4  ;;  %v2000_v54 = vrot.slane %v1999_v37, 2 }
 0x165   : > { %v1971_v55 = vmax.f32 %v1969_v42, %v1970_v47  ;;  %v2007_v56 = vrot.slane %v2006_v4, 2  ;;  %v2032_v57 = vsel %vm2031_vm14, %v1926_v35, %v2030_v41  ;;  %v1994_v62 = vmax.f32 %v1992_v28, %v1993_v46 }
 0x166   : > { %v1959_v58 = vmax.f32 %v1957_v43, %v1958_v51  ;;  %v1965_v59 = vrot.slane %v1964_v52, 2  ;;  %v1978_v60 = vmax.f32 %v1976_v48, %v1977_v53  ;;  %v2034_v61 = vsel %vm2033_vm15, %v1933_v14, %v2032_v57 }
 0x167   : > { %v1972_v63 = vrot.slane %v1971_v55, 2  ;;  %v1954_v0 = vmax.f32 %v1952_v34, %v1953_v49  ;;  %v2036_v1 = vsel %vm2035_vm0, %v1940_v25, %v2034_v61  ;;  %v2001_v7 = vmax.f32 %v1999_v37, %v2000_v54 }
 0x168   : > { %v1960_v2 = vrot.slane %v1959_v58, 1  ;;  %v1966_v3 = vmax.f32 %v1964_v52, %v1965_v59  ;;  %v1979_v5 = vrot.slane %v1978_v60, 2  ;;  %v2038_v6 = vsel %vm2037_vm1, %v1947_v45, %v2036_v1 }
 0x169   : > { %v1973_v8 = vmax.f32 %v1971_v55, %v1972_v63  ;;  %v2040_v9 = vsel %vm2039_vm2, %v1954_v0, %v2038_v6  ;;  %v2008_v17 = vmax.f32 %v2006_v4, %v2007_v56  ;;  %v1988_v12 = vrot.slane %v1987_v50, 1 }
 0x16a   : > { %v1967_v10 = vrot.slane %v1966_v3, 1  ;;  %v1980_v11 = vmax.f32 %v1978_v60, %v1979_v5  ;;  %2050 = vst [vmem:[%s324_s17] sm:$0xff] %v2040_v9  ;;  %v1995_v14 = vrot.slane %v1994_v62, 1  ;;  %v1961_v15 = vmax.f32 %v1959_v58, %v1960_v2 }
 0x16b   : > { %v1974_v13 = vrot.slane %v1973_v8, 1  ;;  %v2002_v20 = vrot.slane %v2001_v7, 1  ;;  %v2009_v23 = vrot.slane %v2008_v17, 1  ;;  %v1989_v24 = vmax.f32 %v1987_v50, %v1988_v12 }
 0x16c   : > { %v1968_v16 = vmax.f32 %v1966_v3, %v1967_v10  ;;  %v1981_v18 = vrot.slane %v1980_v11, 1  ;;  %v1996_v25 = vmax.f32 %v1994_v62, %v1995_v14 }
 0x16d   : > { %v1975_v19 = vmax.f32 %v1973_v8, %v1974_v13  ;;  %v2003_v27 = vmax.f32 %v2001_v7, %v2002_v20  ;;  %v2010_v29 = vmax.f32 %v2008_v17, %v2009_v23 }
 0x16e   : > { %v1982_v21 = vmax.f32 %v1980_v11, %v1981_v18  ;;  %v2041_v22 = vsel %vm2027_vm12, %v1968_v16, %v1961_v15 }
 0x16f   : > { %v2042_v33 = vsel %vm2029_vm13, %v1975_v19, %v2041_v22 }
 0x170   : > { %v2043_v26 = vsel %vm2031_vm14, %v1982_v21, %v2042_v33 }
 0x171   : > { %v2044_v28 = vsel %vm2033_vm15, %v1989_v24, %v2043_v26 }
 0x172   : > { %v2045_v30 = vsel %vm2035_vm0, %v1996_v25, %v2044_v28 }
 0x173   : > { %v2046_v31 = vsel %vm2037_vm1, %v2003_v27, %v2045_v30 }
 0x174   : > { %v2047_v32 = vsel %vm2039_vm2, %v2010_v29, %v2046_v31 }
 0x175   : > { %2051 = vst [vmem:[%s324_s17 + $0x8] sm:$0xff] %v2047_v32 }
 0x176   : > { %2657 = shalt.err (!%p2654_p9)
}
 0x177   : > { %s2658_s20 = scalar_lea.hbm %s3160_s30, 256  ;;  %s2662_s24 = scalar_lea.hbm %s3226_s6, 2048 }
 0x178   : > { %p2659_p10 = scmp.ne.s32.totalorder %s3160_s30, %s2658_s20  ;;  %p2663_p13 = scmp.lt.u32.totalorder %s3160_s30, %s3226_s6 }
 0x179   : > { %p2664_p0 = scmp.lt.u32.totalorder %s2662_s24, %s2658_s20  ;;  %p2666_p2 = scmp.lt.u32.totalorder %s2658_s20, %s3160_s30 }
 0x17a   : > { %p2660_p11 = pnand %p2659_p10, %p2830_p3 }
 0x17b   : > { %p2665_p1 = por %p2664_p0, %p2663_p13 }
 0x17c   : > { %p2661_p12 = pneg %p2660_p11 }
 0x17d   : > { %p2667_p4 = por %p2666_p2, %p2665_p1 }
 0x17f   : > { %p2668_p5 = pnand %p2667_p4, %p2661_p12 }
 0x181   : > { %2671 = shalt.err (!%p2668_p5)
}
 0x182   : > { %s2742_s12 = smov 128   ;;  %s2743_s14 = smov 8  }
 0x183   : > { %2570 = dma.vmem_to_hbm [thread:$0]  (%p2830_p3), %s3162_s25, 256, %s3160_s30, %s3168_s9, %s2742_s12, %s2742_s12, %s2743_s14  }
 0x184 PF: > { %p2576_p6 = scmp.ge.s32.totalorder %s2738_s28, 2  ;;  %s2083_s18 = sand.u32 1, %s2710_s21  }
 0x185   : > { %s2084_s19 = scalar_lea.sflag [#allocation4], %s2083_s18 }
 0x186   : > { %p2573_p7 = pnand %p2576_p6, %p2839_p8 }
 0x188   : > { %2705 = dma.done.wait (!%p2573_p7), %s2084_s19, 256  }
 0x189   : > { %2707 = vsyncadd (!%p2573_p7), %s2084_s19, 4294967040  ;;  %s19_s28 = sadd.s32 1, %s2738_s28   ;;  %s3229_s21 = smov %s2714_s22 }
 0x18a   : > { %p16_p9 = scmp.ge.s32.totalorder %s19_s28, 10   ;;  %s3230_s22 = smov %s2718_s23 }
 0x18b   : > { %s3231_s23 = smov %s2848_s15  ;;  %s3232_s24 = smov %s2730_s26 }
 0x18c   : > { %s3233_s25 = smov %s2734_s27  ;;  %s3234_s26 = smov %s3237_s7 }
 0x18d   : > { %s3235_s27 = smov %s3241_s8  ;;  %18 = sbr.rel (!%p16_p9) target bundleno = 5 (0x5), region = 93 }
 0x194   :  { %2089 = vsyncpa [#allocation4], 1 }
 0x195   :  { %2091 = vsyncpa [#allocation4 + $0x1], 1 }

</bundles_post_ra>
